<compile_context>
chip_gen: v5e
topology: v5e:2x2
jax: 0.10.0
libtpu: 0.0.40
codegen_flags: <defaults>
</compile_context>

<pallas_src>
import functools

import jax
import jax.numpy as jnp
from jax.experimental import pallas as pl
from jax.experimental.pallas import tpu as pltpu

CURRENT_TOKEN_ID = 7  # stand-in for tokenizer.convert_tokens_to_ids('[CURRENT]')

# Lane-dense output slab layout: [sent(3) | resp(2) | crisis(2) | attw(2) | pad...]
_OUT_LANES = 128
_SENT_OFF, _RESP_OFF, _CRISIS_OFF, _ATTW_OFF = 0, 3, 5, 7


# ----------------------------------------------------------------------------
# Pallas kernel: the multitask head (tiled over batch and sequence)
# ----------------------------------------------------------------------------
def _head_kernel(ids_ref, seq_ref,
                 w1h_ref, w1r_ref, b1_ref, w2_ref, b2_ref,
                 wcls_ref, bcls_ref,
                 out_ref,
                 hist_ref, sum_ref, start_ref,
                 *, seq_len, ts):
    k = pl.program_id(1)
    nk = pl.num_programs(1)

    seq = seq_ref[...]                                  # (TB, TS, H) compute dtype

    # ---- init (first S tile of each batch tile) ----
    @pl.when(k == 0)
    def _init():
        ids = ids_ref[...]                              # (TB, S) int32, full row
        pos = jax.lax.broadcasted_iota(jnp.int32, ids.shape, 1)
        is_cur = ids == CURRENT_TOKEN_ID
        first_pos = jnp.min(jnp.where(is_cur, pos, seq_len), axis=1, keepdims=True)
        start = jnp.where(first_pos < seq_len, first_pos + 1, 1)      # (TB, 1)
        start_ref[...] = start
        hist_ref[...] = seq[:, 0, :].astype(jnp.float32)              # history rep
        sum_ref[...] = jnp.zeros_like(sum_ref)

    start = start_ref[...]                              # (TB, 1) int32

    # ---- masked reply-sum for this S tile, on the MXU, f32 accumulation ----
    local_pos = (jax.lax.broadcasted_iota(jnp.int32, (seq.shape[0], seq.shape[1]), 1)
                 + k * ts)
    mask = (local_pos >= start).astype(seq.dtype)       # (TB, TS)
    partial = jnp.einsum('bqs,bsh->bqh', mask[:, None, :], seq,
                         preferred_element_type=jnp.float32)[:, 0, :]
    sum_ref[...] += partial

    # ---- finalize (last S tile): gating MLP + fused classifiers ----
    @pl.when(k == nk - 1)
    def _finalize():
        hist = hist_ref[...]                                            # (TB, H) f32
        count = jnp.float32(seq_len) - start.astype(jnp.float32)        # (TB, 1)
        inv_cnt = pl.reciprocal(jnp.maximum(count, 1.0), approx=True)
        mean_reply = sum_ref[...] * inv_cnt
        last_tok = seq[:, ts - 1, :].astype(jnp.float32)                # global pos S-1
        reply = jnp.where(count > 0.0, mean_reply, last_tok)            # (TB, H)

        # attention gating MLP: Linear(2H,64) -> tanh -> Linear(64,2) -> softmax
        a1 = jnp.tanh(
            jnp.dot(hist, w1h_ref[...], preferred_element_type=jnp.float32)
            + jnp.dot(reply, w1r_ref[...], preferred_element_type=jnp.float32)
            + b1_ref[...])                                              # (TB, 64)
        scores = jnp.dot(a1, w2_ref[...],
                         preferred_element_type=jnp.float32) + b2_ref[...]  # (TB, 2)
        m = jnp.max(scores, axis=1, keepdims=True)
        e = jnp.exp(scores - m)
        attw = e * pl.reciprocal(jnp.sum(e, axis=1, keepdims=True), approx=True)

        combined = hist * attw[:, 0:1] + reply * attw[:, 1:2]           # (TB, H)
        # dropout(0.3) -> identity (inference)

        # three classifiers fused into one (H, 128) matmul -> lane-dense slab
        cls = jnp.dot(combined, wcls_ref[...],
                      preferred_element_type=jnp.float32) + bcls_ref[...]  # (TB,128)
        lane = jax.lax.broadcasted_iota(jnp.int32, cls.shape, 1)
        slab = jnp.where(lane == _ATTW_OFF, attw[:, 0:1], cls)
        slab = jnp.where(lane == _ATTW_OFF + 1, attw[:, 1:2], slab)
        out_ref[...] = slab                                             # one dense store


def _choose_seq_tile(S, TB, H, itemsize, budget_bytes=4 * 1024 * 1024, max_ts=None):
    """Largest S-tile that divides S, is a multiple of 8 (or == S), fits budget."""
    limit_elems = budget_bytes // max(TB * H * itemsize, 1)
    best = S
    for d in range(S, 0, -1):
        if S % d:
            continue
        if d % 8 != 0 and d != S:
            continue
        best = d
        if d <= limit_elems and (max_ts is None or d <= max_ts):
            return d
    return best


# ----------------------------------------------------------------------------
# Wrapper: padding, weight fusion, BlockSpecs, pallas_call
# ----------------------------------------------------------------------------
def multitask_head(input_ids, sequence_output, hp, *,
                   seq_dtype=jnp.bfloat16, max_seq_tile=None):
    """Runs the Pallas head kernel. Returns (sent, resp, crisis, attn_weights)."""
    B, S = input_ids.shape
    H = sequence_output.shape[-1]

    TB = 8
    B_pad = ((B + TB - 1) // TB) * TB
    if B_pad != B:
        input_ids = jnp.pad(input_ids, ((0, B_pad - B), (0, 0)))
        sequence_output = jnp.pad(sequence_output,
                                  ((0, B_pad - B), (0, 0), (0, 0)))

    seq = sequence_output.astype(seq_dtype)             # bf16: halves HBM bytes
    itemsize = jnp.dtype(seq_dtype).itemsize
    TS = _choose_seq_tile(S, TB, H, itemsize, max_ts=max_seq_tile)
    assert S % TS == 0
    nk = S // TS

    # Fuse the three classifier heads into one lane-dense (H, 128) weight/bias.
    wcls = jnp.concatenate([hp["ws"], hp["wr"], hp["wc"]], axis=1)      # (H, 7)
    bcls = jnp.concatenate([hp["bs"], hp["br"], hp["bc"]], axis=1)      # (1, 7)
    n_cls = wcls.shape[1]
    wcls = jnp.pad(wcls, ((0, 0), (0, _OUT_LANES - n_cls)))
    bcls = jnp.pad(bcls, ((0, 0), (0, _OUT_LANES - n_cls)))

    weights = (hp["w1h"], hp["w1r"], hp["b1"], hp["w2"], hp["b2"], wcls, bcls)

    def full_spec(shape):
        r = len(shape)
        return pl.BlockSpec(shape, lambda i, k, _r=r: (0,) * _r)

    grid = (B_pad // TB, nk)
    kernel = functools.partial(_head_kernel, seq_len=S, ts=TS)

    weight_bytes = int(sum(int(w.size) * w.dtype.itemsize for w in weights))
    bytes_accessed = int(B_pad * S * H * itemsize + B_pad * S * 4
                         + B_pad * _OUT_LANES * 4 + weight_bytes)
    flops = int(2 * B_pad * S * H
                + 2 * B_pad * (2 * H * 64 + 64 * 2 + H * _OUT_LANES))
    transcendentals = int(B_pad * (64 + 2 + 3))

    # Double-buffered seq/ids tiles + weights + scratch (+margin); explicit limit
    # so the same tiling also fits v7x's smaller scoped/physical VMEM.
    vmem_need = (2 * TB * TS * H * itemsize + 2 * TB * S * 4
                 + 2 * TB * _OUT_LANES * 4 + 2 * weight_bytes
                 + 2 * TB * H * 4 + TB * 128 * 4)
    vmem_limit = int(min(max(2 * vmem_need, 4 << 20), 32 << 20))

    slab = pl.pallas_call(
        kernel,
        out_shape=jax.ShapeDtypeStruct((B_pad, _OUT_LANES), jnp.float32),
        grid_spec=pltpu.PrefetchScalarGridSpec(
            num_scalar_prefetch=0,
            grid=grid,
            in_specs=[
                pl.BlockSpec((TB, S), lambda i, k: (i, 0)),            # full ids row
                pl.BlockSpec((TB, TS, H), lambda i, k: (i, k, 0)),     # seq tile
                *[full_spec(w.shape) for w in weights],
            ],
            out_specs=pl.BlockSpec((TB, _OUT_LANES), lambda i, k: (i, 0)),
            scratch_shapes=[
                pltpu.VMEM((TB, H), jnp.float32),   # history rep
                pltpu.VMEM((TB, H), jnp.float32),   # reply-sum accumulator
                pltpu.VMEM((TB, 1), jnp.int32),     # reply start position
            ]),
        compiler_params=pltpu.CompilerParams(
            dimension_semantics=("parallel", "arbitrary"),
            vmem_limit_bytes=vmem_limit),
        cost_estimate=pl.CostEstimate(flops=flops,
                                      transcendentals=transcendentals,
                                      bytes_accessed=bytes_accessed),
    )(input_ids, seq, *weights)

    sent = slab[:B, _SENT_OFF:_SENT_OFF + hp["ws"].shape[1]]
    resp = slab[:B, _RESP_OFF:_RESP_OFF + hp["wr"].shape[1]]
    crisis = slab[:B, _CRISIS_OFF:_CRISIS_OFF + hp["wc"].shape[1]]
    attw = slab[:B, _ATTW_OFF:_ATTW_OFF + 2]
    return sent, resp, crisis, attw


# ----------------------------------------------------------------------------
# Synthetic deterministic stand-in for roberta-base (plain JAX glue)
# ----------------------------------------------------------------------------
def synthetic_roberta(p, input_ids, attention_mask):
    B, S = input_ids.shape
    H = p["tok_emb"].shape[-1]

    def ln(x, g, b):
        mu = jnp.mean(x, axis=-1, keepdims=True)
        var = jnp.mean((x - mu) ** 2, axis=-1, keepdims=True)
        return (x - mu) / jnp.sqrt(var + 1e-5) * g + b

    x = p["tok_emb"][input_ids] + p["pos_emb"][None, :S, :]
    x = ln(x, p["ln0_g"], p["ln0_b"])
    q = x @ p["wq"]
    k = x @ p["wk"]
    v = x @ p["wv"]
    scores = jnp.einsum("bqh,bkh->bqk", q, k) / jnp.sqrt(jnp.float32(H))
    mask = attention_mask[:, None, :].astype(jnp.float32)
    scores = scores + (1.0 - mask) * -1e9
    attn = jax.nn.softmax(scores, axis=-1)
    x = x + jnp.einsum("bqk,bkh->bqh", attn, v) @ p["wo"]
    x = ln(x, p["ln1_g"], p["ln1_b"])
    h = jnp.tanh(x @ p["w_ff1"] + p["b_ff1"])
    x = x + h @ p["w_ff2"] + p["b_ff2"]
    x = ln(x, p["ln2_g"], p["ln2_b"])
    return x  # (B, S, H)


# ----------------------------------------------------------------------------
# Deterministic parameter construction
# ----------------------------------------------------------------------------
def make_params(key, vocab, max_seq, H, n_sent=3, n_resp=2, n_crisis=2):
    ks = jax.random.split(key, 20)
    g = lambda k, shape: (0.02 * jax.random.normal(k, shape)).astype(jnp.float32)

    enc = {
        "tok_emb": g(ks[0], (vocab, H)),
        "pos_emb": g(ks[1], (max_seq, H)),
        "ln0_g": jnp.ones((H,), jnp.float32), "ln0_b": jnp.zeros((H,), jnp.float32),
        "wq": g(ks[2], (H, H)), "wk": g(ks[3], (H, H)), "wv": g(ks[4], (H, H)),
        "wo": g(ks[5], (H, H)),
        "ln1_g": jnp.ones((H,), jnp.float32), "ln1_b": jnp.zeros((H,), jnp.float32),
        "w_ff1": g(ks[6], (H, 2 * H)), "b_ff1": jnp.zeros((2 * H,), jnp.float32),
        "w_ff2": g(ks[7], (2 * H, H)), "b_ff2": jnp.zeros((H,), jnp.float32),
        "ln2_g": jnp.ones((H,), jnp.float32), "ln2_b": jnp.zeros((H,), jnp.float32),
    }

    # Head weights stored pre-transposed to (in, out); biases as (1, out).
    w1 = g(ks[8], (64, 2 * H))                          # torch Linear(2H, 64) weight
    head = {
        "w1h": jnp.transpose(w1[:, :H]),                # (H, 64)
        "w1r": jnp.transpose(w1[:, H:]),                # (H, 64)
        "b1": g(ks[9], (1, 64)),
        "w2": jnp.transpose(g(ks[10], (2, 64))),        # (64, 2)
        "b2": g(ks[11], (1, 2)),
        "ws": jnp.transpose(g(ks[12], (n_sent, H))),    # (H, 3)
        "bs": g(ks[13], (1, n_sent)),
        "wr": jnp.transpose(g(ks[14], (n_resp, H))),    # (H, 2)
        "br": g(ks[15], (1, n_resp)),
        "wc": jnp.transpose(g(ks[16], (n_crisis, H))),  # (H, 2)
        "bc": g(ks[17], (1, n_crisis)),
    }
    return enc, head


# ----------------------------------------------------------------------------
# Pure-JAX reference head (f32) for a numerical sanity check
# ----------------------------------------------------------------------------
def reference_head(input_ids, seq, hp):
    B, S, H = seq.shape
    pos = jnp.arange(S)[None, :]
    is_cur = input_ids == CURRENT_TOKEN_ID
    has_cur = jnp.any(is_cur, axis=1, keepdims=True)
    first_pos = jnp.min(jnp.where(is_cur, pos, S), axis=1, keepdims=True)
    start = jnp.where(has_cur, first_pos + 1, 1)
    mask = (pos >= start).astype(jnp.float32)
    count = mask.sum(axis=1, keepdims=True)
    summed = jnp.einsum('bs,bsh->bh', mask, seq)
    reply = jnp.where(count > 0, summed / jnp.maximum(count, 1.0), seq[:, -1, :])
    hist = seq[:, 0, :]
    a1 = jnp.tanh(hist @ hp["w1h"] + reply @ hp["w1r"] + hp["b1"])
    scores = a1 @ hp["w2"] + hp["b2"]
    attw = jax.nn.softmax(scores, axis=1)
    combined = hist * attw[:, 0:1] + reply * attw[:, 1:2]
    sent = combined @ hp["ws"] + hp["bs"]
    resp = combined @ hp["wr"] + hp["br"]
    crisis = combined @ hp["wc"] + hp["bc"]
    return sent, resp, crisis, attw


# ----------------------------------------------------------------------------
if __name__ == "__main__":
    B, S, H, VOCAB = 4, 16, 32, 64
    key = jax.random.PRNGKey(0)
    enc_params, head_params = make_params(key, VOCAB, S, H)

    # Filler ids drawn from [8, VOCAB) so they never collide with CURRENT_TOKEN_ID.
    ids_key = jax.random.fold_in(key, 123)
    input_ids = jax.random.randint(ids_key, (B, S), 8, VOCAB, dtype=jnp.int32)
    # ex0: [CURRENT] at pos 3; ex1: no [CURRENT]; ex2: [CURRENT] in the 2nd S-tile;
    # ex3: [CURRENT] at the last position -> empty reply -> last-token fallback.
    input_ids = input_ids.at[0, 3].set(CURRENT_TOKEN_ID)
    input_ids = input_ids.at[2, 10].set(CURRENT_TOKEN_ID)
    input_ids = input_ids.at[3, S - 1].set(CURRENT_TOKEN_ID)
    attention_mask = jnp.ones((B, S), dtype=jnp.int32)

    sequence_output = synthetic_roberta(enc_params, input_ids, attention_mask)

    # max_seq_tile=8 forces two S-tiles so the accumulate/init/finalize path runs.
    outs = multitask_head(input_ids, sequence_output, head_params, max_seq_tile=8)
    outs = jax.block_until_ready(outs)
    sent_logits, resp_logits, crisis_logits, attn_w = outs

    assert sent_logits.shape == (B, 3)
    assert resp_logits.shape == (B, 2)
    assert crisis_logits.shape == (B, 2)
    assert attn_w.shape == (B, 2)

    ref = reference_head(input_ids, sequence_output.astype(jnp.float32), head_params)
    for got, want in zip(outs, ref):
        assert jnp.allclose(got, want, atol=5e-2, rtol=5e-2)

    print("KERNEL_OK")
</pallas_src>

<mosaic_0001>
module attributes {stable_mosaic.version = 11 : i64} {
  func.func @_head_kernel(%arg0: i32, %arg1: i32, %arg2: memref<8x16xi32, #tpu.memory_space<vmem>>, %arg3: memref<8x8x32xbf16, #tpu.memory_space<vmem>>, %arg4: memref<32x64xf32, #tpu.memory_space<vmem>>, %arg5: memref<32x64xf32, #tpu.memory_space<vmem>>, %arg6: memref<1x64xf32, #tpu.memory_space<vmem>>, %arg7: memref<64x2xf32, #tpu.memory_space<vmem>>, %arg8: memref<1x2xf32, #tpu.memory_space<vmem>>, %arg9: memref<32x128xf32, #tpu.memory_space<vmem>>, %arg10: memref<1x128xf32, #tpu.memory_space<vmem>>, %arg11: memref<8x128xf32, #tpu.memory_space<vmem>>, %arg12: memref<8x32xf32, #tpu.memory_space<vmem>>, %arg13: memref<8x32xf32, #tpu.memory_space<vmem>>, %arg14: memref<8x1xi32, #tpu.memory_space<vmem>>) attributes {dimension_semantics = [#tpu.dimension_semantics<parallel>, #tpu.dimension_semantics<arbitrary>], iteration_bounds = array<i64: 1, 2>, scalar_prefetch = 0 : i64, scratch_operands = 3 : i64, tpu.core_type = #tpu.core_type<tc>, window_params = [{transform_indices = @transform_0, window_bounds = array<i64: 8, 16>}, {transform_indices = @transform_1, window_bounds = array<i64: 8, 8, 32>}, {pipeline_mode = #tpu.pipeline_mode<synchronous>, transform_indices = @transform_2, window_bounds = array<i64: 32, 64>}, {pipeline_mode = #tpu.pipeline_mode<synchronous>, transform_indices = @transform_3, window_bounds = array<i64: 32, 64>}, {pipeline_mode = #tpu.pipeline_mode<synchronous>, transform_indices = @transform_4, window_bounds = array<i64: 1, 64>}, {pipeline_mode = #tpu.pipeline_mode<synchronous>, transform_indices = @transform_5, window_bounds = array<i64: 64, 2>}, {pipeline_mode = #tpu.pipeline_mode<synchronous>, transform_indices = @transform_6, window_bounds = array<i64: 1, 2>}, {pipeline_mode = #tpu.pipeline_mode<synchronous>, transform_indices = @transform_7, window_bounds = array<i64: 32, 128>}, {pipeline_mode = #tpu.pipeline_mode<synchronous>, transform_indices = @transform_8, window_bounds = array<i64: 1, 128>}, {transform_indices = @transform_9, window_bounds = array<i64: 8, 128>}]} {
    %c0 = arith.constant 0 : index
    %c0_0 = arith.constant 0 : index
    %c0_1 = arith.constant 0 : index
    %0 = vector.load %arg3[%c0, %c0_0, %c0_1] : memref<8x8x32xbf16, #tpu.memory_space<vmem>>, vector<8x8x32xbf16>
    %c0_i32 = arith.constant 0 : i32
    %1 = arith.cmpi eq, %arg1, %c0_i32 : i32
    %2 = arith.extui %1 : i1 to i32
    %c0_i32_2 = arith.constant 0 : i32
    %3 = arith.cmpi ne, %2, %c0_i32_2 : i32
    scf.if %3 {
      %c0_10 = arith.constant 0 : index
      %c0_11 = arith.constant 0 : index
      %23 = vector.load %arg2[%c0_10, %c0_11] : memref<8x16xi32, #tpu.memory_space<vmem>>, vector<8x16xi32>
      %24 = tpu.iota {dimensions = array<i32: 1>} : vector<8x16xi32>
      %c7_i32 = arith.constant 7 : i32
      %25 = vector.broadcast %c7_i32 : i32 to vector<8x16xi32>
      %26 = arith.cmpi eq, %23, %25 : vector<8x16xi32>
      %c16_i32 = arith.constant 16 : i32
      %27 = vector.broadcast %c16_i32 : i32 to vector<8x16xi32>
      %28 = arith.select %26, %24, %27 : vector<8x16xi1>, vector<8x16xi32>
      %cst_12 = arith.constant dense<2147483647> : vector<8xi32>
      %29 = vector.multi_reduction <minsi>, %28, %cst_12 [1] : vector<8x16xi32> to vector<8xi32>
      %30 = vector.shape_cast %29 : vector<8xi32> to vector<8x1xi32>
      %c16_i32_13 = arith.constant 16 : i32
      %31 = vector.broadcast %c16_i32_13 : i32 to vector<8x1xi32>
      %32 = arith.cmpi slt, %30, %31 : vector<8x1xi32>
      %c1_i32_14 = arith.constant 1 : i32
      %33 = vector.broadcast %c1_i32_14 : i32 to vector<8x1xi32>
      %34 = arith.addi %30, %33 : vector<8x1xi32>
      %c1_i32_15 = arith.constant 1 : i32
      %35 = vector.broadcast %c1_i32_15 : i32 to vector<8x1xi32>
      %36 = arith.select %32, %34, %35 : vector<8x1xi1>, vector<8x1xi32>
      %c0_16 = arith.constant 0 : index
      %c0_17 = arith.constant 0 : index
      %37 = vector.load %arg14[%c0_16, %c0_17] : memref<8x1xi32, #tpu.memory_space<vmem>>, vector<8x1xi32>
      tpu.vector_store %arg14[%c0_16, %c0_17], %36 {strides = array<i32>} : memref<8x1xi32, #tpu.memory_space<vmem>>, vector<8x1xi32>,
      %38 = vector.extract_strided_slice %0 {offsets = [0, 0, 0], sizes = [8, 1, 32], strides = [1, 1, 1]} : vector<8x8x32xbf16> to vector<8x1x32xbf16>
      %39 = vector.shape_cast %38 : vector<8x1x32xbf16> to vector<8x32xbf16>
      %40 = arith.extf %39 : vector<8x32xbf16> to vector<8x32xf32>
      %c0_18 = arith.constant 0 : index
      %c0_19 = arith.constant 0 : index
      %41 = vector.load %arg12[%c0_18, %c0_19] : memref<8x32xf32, #tpu.memory_space<vmem>>, vector<8x32xf32>
      tpu.vector_store %arg12[%c0_18, %c0_19], %40 {strides = array<i32>} : memref<8x32xf32, #tpu.memory_space<vmem>>, vector<8x32xf32>,
      %cst_20 = arith.constant 0.000000e+00 : f32
      %42 = vector.broadcast %cst_20 : f32 to vector<8x32xf32>
      %c0_21 = arith.constant 0 : index
      %c0_22 = arith.constant 0 : index
      %43 = vector.load %arg13[%c0_21, %c0_22] : memref<8x32xf32, #tpu.memory_space<vmem>>, vector<8x32xf32>
      tpu.vector_store %arg13[%c0_21, %c0_22], %42 {strides = array<i32>} : memref<8x32xf32, #tpu.memory_space<vmem>>, vector<8x32xf32>,
    } else {
    }
    %c0_3 = arith.constant 0 : index
    %c0_4 = arith.constant 0 : index
    %4 = vector.load %arg14[%c0_3, %c0_4] : memref<8x1xi32, #tpu.memory_space<vmem>>, vector<8x1xi32>
    %5 = tpu.iota {dimensions = array<i32: 1>} : vector<8x8xi32>
    %c8_i32 = arith.constant 8 : i32
    %6 = arith.muli %arg1, %c8_i32 : i32
    %7 = vector.broadcast %6 : i32 to vector<8x8xi32>
    %8 = arith.addi %5, %7 : vector<8x8xi32>
    %9 = vector.broadcast %4 : vector<8x1xi32> to vector<8x8xi32>
    %10 = arith.cmpi sge, %8, %9 : vector<8x8xi32>
    %11 = arith.extui %10 : vector<8x8xi1> to vector<8x8xi32>
    %12 = arith.sitofp %11 : vector<8x8xi32> to vector<8x8xf32>
    %13 = arith.truncf %12 : vector<8x8xf32> to vector<8x8xbf16>
    %14 = vector.shape_cast %13 : vector<8x8xbf16> to vector<8x1x8xbf16>
    "tpu.trace_start"() <{level = 10 : i32, message = "bqs,bsh->bqh"}> : () -> ()
    %cst = arith.constant dense<0.000000e+00> : vector<8x1x32xf32>
    %15 = tpu.matmul %14, %0, %cst {dimension_numbers = #tpu.dot_dimension_numbers<[2], [1], [1], [2], [0, 0, 0, 1, 1, 2], [0], [0]>} : vector<8x1x8xbf16>, vector<8x8x32xbf16>, vector<8x1x32xf32> -> vector<8x1x32xf32>
    "tpu.trace_stop"() : () -> ()
    %16 = vector.shape_cast %15 : vector<8x1x32xf32> to vector<8x32xf32>
    %c0_5 = arith.constant 0 : index
    %c0_6 = arith.constant 0 : index
    %17 = vector.load %arg13[%c0_5, %c0_6] : memref<8x32xf32, #tpu.memory_space<vmem>>, vector<8x32xf32>
    %18 = arith.addf %17, %16 : vector<8x32xf32>
    %c0_7 = arith.constant 0 : index
    %c0_8 = arith.constant 0 : index
    %19 = vector.load %arg13[%c0_7, %c0_8] : memref<8x32xf32, #tpu.memory_space<vmem>>, vector<8x32xf32>
    tpu.vector_store %arg13[%c0_7, %c0_8], %18 {strides = array<i32>} : memref<8x32xf32, #tpu.memory_space<vmem>>, vector<8x32xf32>,
    %c1_i32 = arith.constant 1 : i32
    %20 = arith.cmpi eq, %arg1, %c1_i32 : i32
    %21 = arith.extui %20 : i1 to i32
    %c0_i32_9 = arith.constant 0 : i32
    %22 = arith.cmpi ne, %21, %c0_i32_9 : i32
    scf.if %22 {
      %c0_10 = arith.constant 0 : index
      %c0_11 = arith.constant 0 : index
      %23 = vector.load %arg12[%c0_10, %c0_11] : memref<8x32xf32, #tpu.memory_space<vmem>>, vector<8x32xf32>
      %24 = arith.sitofp %4 : vector<8x1xi32> to vector<8x1xf32>
      %cst_12 = arith.constant 1.600000e+01 : f32
      %25 = vector.broadcast %cst_12 : f32 to vector<8x1xf32>
      %26 = arith.subf %25, %24 : vector<8x1xf32>
      %cst_13 = arith.constant 1.000000e+00 : f32
      %27 = vector.broadcast %cst_13 : f32 to vector<8x1xf32>
      %28 = arith.maximumf %26, %27 : vector<8x1xf32>
      %29 = tpu.reciprocal %28 {approx = true} : vector<8x1xf32> -> vector<8x1xf32>
      %c0_14 = arith.constant 0 : index
      %c0_15 = arith.constant 0 : index
      %30 = vector.load %arg13[%c0_14, %c0_15] : memref<8x32xf32, #tpu.memory_space<vmem>>, vector<8x32xf32>
      %31 = vector.broadcast %29 : vector<8x1xf32> to vector<8x32xf32>
      %32 = arith.mulf %30, %31 : vector<8x32xf32>
      %33 = vector.extract_strided_slice %0 {offsets = [0, 7, 0], sizes = [8, 1, 32], strides = [1, 1, 1]} : vector<8x8x32xbf16> to vector<8x1x32xbf16>
      %34 = vector.shape_cast %33 : vector<8x1x32xbf16> to vector<8x32xbf16>
      %35 = arith.extf %34 : vector<8x32xbf16> to vector<8x32xf32>
      %cst_16 = arith.constant 0.000000e+00 : f32
      %36 = vector.broadcast %cst_16 : f32 to vector<8x1xf32>
      %37 = arith.cmpf ogt, %26, %36 : vector<8x1xf32>
      %38 = vector.shape_cast %37 : vector<8x1xi1> to vector<8x1xi1>
      %39 = vector.broadcast %38 : vector<8x1xi1> to vector<8x32xi1>
      %40 = arith.select %39, %32, %35 : vector<8x32xi1>, vector<8x32xf32>
      %c0_17 = arith.constant 0 : index
      %c0_18 = arith.constant 0 : index
      %41 = vector.load %arg4[%c0_17, %c0_18] : memref<32x64xf32, #tpu.memory_space<vmem>>, vector<32x64xf32>
      %cst_19 = arith.constant dense<0.000000e+00> : vector<8x64xf32>
      %42 = tpu.matmul %23, %41, %cst_19 {dimension_numbers = #tpu.dot_dimension_numbers<[1], [0], [0], [1], [0, 0, 1, 1], [], []>} : vector<8x32xf32>, vector<32x64xf32>, vector<8x64xf32> -> vector<8x64xf32>
      %c0_20 = arith.constant 0 : index
      %c0_21 = arith.constant 0 : index
      %43 = vector.load %arg5[%c0_20, %c0_21] : memref<32x64xf32, #tpu.memory_space<vmem>>, vector<32x64xf32>
      %cst_22 = arith.constant dense<0.000000e+00> : vector<8x64xf32>
      %44 = tpu.matmul %40, %43, %cst_22 {dimension_numbers = #tpu.dot_dimension_numbers<[1], [0], [0], [1], [0, 0, 1, 1], [], []>} : vector<8x32xf32>, vector<32x64xf32>, vector<8x64xf32> -> vector<8x64xf32>
      %45 = arith.addf %42, %44 : vector<8x64xf32>
      %c0_23 = arith.constant 0 : index
      %c0_24 = arith.constant 0 : index
      %46 = vector.load %arg6[%c0_23, %c0_24] : memref<1x64xf32, #tpu.memory_space<vmem>>, vector<1x64xf32>
      %47 = vector.broadcast %46 : vector<1x64xf32> to vector<8x64xf32>
      %48 = arith.addf %45, %47 : vector<8x64xf32>
      %49 = math.tanh %48 : vector<8x64xf32>
      %c0_25 = arith.constant 0 : index
      %c0_26 = arith.constant 0 : index
      %50 = vector.load %arg7[%c0_25, %c0_26] : memref<64x2xf32, #tpu.memory_space<vmem>>, vector<64x2xf32>
      %cst_27 = arith.constant dense<0.000000e+00> : vector<8x2xf32>
      %51 = tpu.matmul %49, %50, %cst_27 {dimension_numbers = #tpu.dot_dimension_numbers<[1], [0], [0], [1], [0, 0, 1, 1], [], []>} : vector<8x64xf32>, vector<64x2xf32>, vector<8x2xf32> -> vector<8x2xf32>
      %c0_28 = arith.constant 0 : index
      %c0_29 = arith.constant 0 : index
      %52 = vector.load %arg8[%c0_28, %c0_29] : memref<1x2xf32, #tpu.memory_space<vmem>>, vector<1x2xf32>
      %53 = vector.broadcast %52 : vector<1x2xf32> to vector<8x2xf32>
      %54 = arith.addf %51, %53 : vector<8x2xf32>
      %cst_30 = arith.constant dense<0xFF800000> : vector<8xf32>
      %55 = vector.multi_reduction <maximumf>, %54, %cst_30 [1] : vector<8x2xf32> to vector<8xf32>
      %56 = vector.shape_cast %55 : vector<8xf32> to vector<8x1xf32>
      %57 = vector.broadcast %56 : vector<8x1xf32> to vector<8x2xf32>
      %58 = arith.subf %54, %57 : vector<8x2xf32>
      %59 = math.exp %58 : vector<8x2xf32>
      %cst_31 = arith.constant dense<0.000000e+00> : vector<8xf32>
      %60 = vector.multi_reduction <add>, %59, %cst_31 [1] : vector<8x2xf32> to vector<8xf32>
      %61 = vector.shape_cast %60 : vector<8xf32> to vector<8x1xf32>
      %62 = tpu.reciprocal %61 {approx = true} : vector<8x1xf32> -> vector<8x1xf32>
      %63 = vector.broadcast %62 : vector<8x1xf32> to vector<8x2xf32>
      %64 = arith.mulf %59, %63 : vector<8x2xf32>
      %65 = vector.extract_strided_slice %64 {offsets = [0, 0], sizes = [8, 1], strides = [1, 1]} : vector<8x2xf32> to vector<8x1xf32>
      %66 = vector.broadcast %65 : vector<8x1xf32> to vector<8x32xf32>
      %67 = arith.mulf %23, %66 : vector<8x32xf32>
      %68 = vector.extract_strided_slice %64 {offsets = [0, 1], sizes = [8, 1], strides = [1, 1]} : vector<8x2xf32> to vector<8x1xf32>
      %69 = vector.broadcast %68 : vector<8x1xf32> to vector<8x32xf32>
      %70 = arith.mulf %40, %69 : vector<8x32xf32>
      %71 = arith.addf %67, %70 : vector<8x32xf32>
      %c0_32 = arith.constant 0 : index
      %c0_33 = arith.constant 0 : index
      %72 = vector.load %arg9[%c0_32, %c0_33] : memref<32x128xf32, #tpu.memory_space<vmem>>, vector<32x128xf32>
      %cst_34 = arith.constant dense<0.000000e+00> : vector<8x128xf32>
      %73 = tpu.matmul %71, %72, %cst_34 {dimension_numbers = #tpu.dot_dimension_numbers<[1], [0], [0], [1], [0, 0, 1, 1], [], []>} : vector<8x32xf32>, vector<32x128xf32>, vector<8x128xf32> -> vector<8x128xf32>
      %c0_35 = arith.constant 0 : index
      %c0_36 = arith.constant 0 : index
      %74 = vector.load %arg10[%c0_35, %c0_36] : memref<1x128xf32, #tpu.memory_space<vmem>>, vector<1x128xf32>
      %75 = vector.broadcast %74 : vector<1x128xf32> to vector<8x128xf32>
      %76 = arith.addf %73, %75 : vector<8x128xf32>
      %77 = tpu.iota {dimensions = array<i32: 1>} : vector<8x128xi32>
      %c7_i32 = arith.constant 7 : i32
      %78 = vector.broadcast %c7_i32 : i32 to vector<8x128xi32>
      %79 = arith.cmpi eq, %77, %78 : vector<8x128xi32>
      %80 = vector.extract_strided_slice %64 {offsets = [0, 0], sizes = [8, 1], strides = [1, 1]} : vector<8x2xf32> to vector<8x1xf32>
      %81 = vector.shape_cast %80 : vector<8x1xf32> to vector<8x1xf32>
      %82 = vector.broadcast %81 : vector<8x1xf32> to vector<8x128xf32>
      %83 = arith.select %79, %82, %76 : vector<8x128xi1>, vector<8x128xf32>
      %c8_i32_37 = arith.constant 8 : i32
      %84 = vector.broadcast %c8_i32_37 : i32 to vector<8x128xi32>
      %85 = arith.cmpi eq, %77, %84 : vector<8x128xi32>
      %86 = vector.extract_strided_slice %64 {offsets = [0, 1], sizes = [8, 1], strides = [1, 1]} : vector<8x2xf32> to vector<8x1xf32>
      %87 = vector.shape_cast %86 : vector<8x1xf32> to vector<8x1xf32>
      %88 = vector.broadcast %87 : vector<8x1xf32> to vector<8x128xf32>
      %89 = arith.select %85, %88, %83 : vector<8x128xi1>, vector<8x128xf32>
      %c0_38 = arith.constant 0 : index
      %c0_39 = arith.constant 0 : index
      %90 = vector.load %arg11[%c0_38, %c0_39] : memref<8x128xf32, #tpu.memory_space<vmem>>, vector<8x128xf32>
      tpu.vector_store %arg11[%c0_38, %c0_39], %89 {strides = array<i32>} : memref<8x128xf32, #tpu.memory_space<vmem>>, vector<8x128xf32>,
    } else {
    }
    return
  }
  func.func @transform_0(%arg0: i32, %arg1: i32) -> (i32, i32) {
    %c0_i32 = arith.constant 0 : i32
    %c0_i32_0 = arith.constant 0 : i32
    return %arg0, %c0_i32 : i32, i32
  }
  func.func @transform_1(%arg0: i32, %arg1: i32) -> (i32, i32, i32) {
    %c0_i32 = arith.constant 0 : i32
    %c0_i32_0 = arith.constant 0 : i32
    return %arg0, %arg1, %c0_i32 : i32, i32, i32
  }
  func.func @transform_2(%arg0: i32, %arg1: i32) -> (i32, i32) {
    %c0_i32 = arith.constant 0 : i32
    %c0_i32_0 = arith.constant 0 : i32
    %c0_i32_1 = arith.constant 0 : i32
    return %c0_i32, %c0_i32_0 : i32, i32
  }
  func.func @transform_3(%arg0: i32, %arg1: i32) -> (i32, i32) {
    %c0_i32 = arith.constant 0 : i32
    %c0_i32_0 = arith.constant 0 : i32
    %c0_i32_1 = arith.constant 0 : i32
    return %c0_i32, %c0_i32_0 : i32, i32
  }
  func.func @transform_4(%arg0: i32, %arg1: i32) -> (i32, i32) {
    %c0_i32 = arith.constant 0 : i32
    %c0_i32_0 = arith.constant 0 : i32
    %c0_i32_1 = arith.constant 0 : i32
    return %c0_i32, %c0_i32_0 : i32, i32
  }
  func.func @transform_5(%arg0: i32, %arg1: i32) -> (i32, i32) {
    %c0_i32 = arith.constant 0 : i32
    %c0_i32_0 = arith.constant 0 : i32
    %c0_i32_1 = arith.constant 0 : i32
    return %c0_i32, %c0_i32_0 : i32, i32
  }
  func.func @transform_6(%arg0: i32, %arg1: i32) -> (i32, i32) {
    %c0_i32 = arith.constant 0 : i32
    %c0_i32_0 = arith.constant 0 : i32
    %c0_i32_1 = arith.constant 0 : i32
    return %c0_i32, %c0_i32_0 : i32, i32
  }
  func.func @transform_7(%arg0: i32, %arg1: i32) -> (i32, i32) {
    %c0_i32 = arith.constant 0 : i32
    %c0_i32_0 = arith.constant 0 : i32
    %c0_i32_1 = arith.constant 0 : i32
    return %c0_i32, %c0_i32_0 : i32, i32
  }
  func.func @transform_8(%arg0: i32, %arg1: i32) -> (i32, i32) {
    %c0_i32 = arith.constant 0 : i32
    %c0_i32_0 = arith.constant 0 : i32
    %c0_i32_1 = arith.constant 0 : i32
    return %c0_i32, %c0_i32_0 : i32, i32
  }
  func.func @transform_9(%arg0: i32, %arg1: i32) -> (i32, i32) {
    %c0_i32 = arith.constant 0 : i32
    %c0_i32_0 = arith.constant 0 : i32
    return %arg0, %c0_i32 : i32, i32
  }
}

</mosaic_0001>

<bundles_post_ra>
// kernel: tpu_custom_call.1
= control target key start
LH: loop header
LB: loop body
LE: loop exit
PB: predicated region body
PF: predicated region fallthrough
CT: control target
= control target key end

     0   :  { %s1787_s0 = inlined_call_operand.hbm [shape: s32[8,16], index: 0, kind: input, shape index: {}]   ;;  %s1788_s1 = inlined_call_operand.vmem [shape: bf16[8,16,32], index: 1, kind: input, shape index: {}]   ;;  %s1789_s2 = inlined_call_operand.hbm [shape: f32[32,64], index: 2, kind: input, shape index: {}]   ;;  %s1790_s3 = inlined_call_operand.hbm [shape: f32[32,64], index: 3, kind: input, shape index: {}]   ;;  %s1791_s4 = inlined_call_operand.vmem [shape: f32[1,64], index: 4, kind: input, shape index: {}]   ;;  %s1792_s5 = inlined_call_operand.vmem [shape: f32[64,2], index: 5, kind: input, shape index: {}]   ;;  %s1793_s6 = inlined_call_operand.vmem [shape: f32[1,2], index: 6, kind: input, shape index: {}]   ;;  %s1794_s7 = inlined_call_operand.hbm [shape: f32[32,128], index: 7, kind: input, shape index: {}]   ;;  %s1795_s8 = inlined_call_operand.vmem [shape: f32[1,128], index: 8, kind: input, shape index: {}]   ;;  %s1796_s9 = inlined_call_operand.hbm [shape: f32[8,128], index: 9, kind: output, shape index: {}]  }
   0x1   :  { %1799 = sst [smem:[#allocation21_spill]] %s1789_s2 }
   0x2   :  { %1800 = sst [smem:[#allocation22_spill]] %s1795_s8 }
   0x3   :  { %1801 = sst [smem:[#allocation23_spill]] %s1796_s9 }
   0x4   :  { %14 = vsyncpa [#allocation6], 0 }
   0x5   :  { %15 = vsyncpa [#allocation10], 0 }
   0x6   :  { %16 = vsyncpa [#allocation13], 0 }
   0x7   :  { %17 = vsyncpa [#allocation7], 0  ;;  %s1544_s30 = smov 0   ;;  %s1546_s10 = smov 0  }
   0x8   :  { %s1548_s11 = smov 0   ;;  %s1550_s12 = smov 0  }
   0x9   :  { %s1552_s13 = smov 0  }
   0xa LB: > { %s1797_s14 = sadd.s32 4294967295, %s1480_s13   ;;  %s32_s15 = sadd.s32 1, %s1476_s12  ;;  %s1480_s13 = sphi %s1552_s13, %s23_s13   ;;  %s1476_s12 = sphi %s1550_s12, %s1817_s12   ;;  %s1472_s11 = sphi %s1548_s11, %s1816_s11   ;;  %s1468_s10 = sphi %s1546_s10, %s1815_s10   ;;  %s1464_s30 = sphi %s1544_s30, %s1814_s30  }
   0xb   : > { %p33_p0 = scmp.ge.s32.totalorder %s32_s15, 2  ;;  %s70_s16 = sadd.s32 1, %s1468_s10 }
   0xc   : > { %p77_p1 = scmp.ne.s32.totalorder %s1468_s10, %s1464_s30  ;;  %p78_p2 = scmp.eq.s32.totalorder %s1480_s13, 0 }
   0xd   : > { %s1819_s15 = smov (%p33_p0, %s32_s15), 0  ;;  %p1129_p4 = scmp.ge.s32.totalorder %s1480_s13, 1 }
   0xe   : > { %1802 = sst [smem:[#allocation19_spill]] %s1819_s15  ;;  %p1577_p3 = por %p78_p2, %p77_p1 }
   0xf   : > { %s66_s18 = ssub.s32 %s1476_s12, %s1819_s15  ;;  %p267_p5 = scmp.lt.s32.totalorder %s1480_s13, 3 }
  0x10   : > { %p68_p6 = scmp.eq.s32.totalorder %s66_s18, 0  ;;  %p1591_p8 = scmp.eq.s32.totalorder %s1797_s14, 0 }
  0x11   : > { %p1585_p7 = pnand %p1129_p4, %p267_p5  ;;  %s1807_s2 = sld [smem:[#allocation21_spill]] }
  0x12   : > { %s1596_s21 = scalar_select %p68_p6, %s1468_s10, %s70_s16  }
  0x13   : > { %p1187_p9 = pneg %p1585_p7  ;;  %s1482_s26 = smov [#allocation9]  }
  0x14   : > { %1806 = sst [smem:[#allocation20_spill]] %s1596_s21  ;;  %s294_s27 = sshll.u32 %s1482_s26, 4  ;;  %s295_s27 = int_to_ptr.vmem [resolvable:$true] %s294_s27 }
  0x15   : > { %p1605_p10 = pnand %p1591_p8, %p1187_p9  ;;  %s1483_s28 = smov 128  }
  0x16   : > { %s1484_s29 = smov 8   ;;  %s281_s22 = sshll.u32 %s1787_s0, 4  ;;  %s282_s22 = int_to_ptr.hbm [resolvable:$true] %s281_s22 }
  0x17   : > { %s292_s24 = sshll.u32 %s1807_s2, 4  ;;  %s306_s2 = sshll.u32 %s1790_s3, 4  ;;  %s293_s24 = int_to_ptr.hbm [resolvable:$true] %s292_s24  ;;  %s307_s2 = int_to_ptr.hbm [resolvable:$true] %s306_s2 }
  0x18   : > { %1193 = dma.hbm_to_vmem [thread:$0]  (!%p1605_p10), %s293_s24, 512, %s295_s27, [#allocation10], %s1483_s28, %s1483_s28, %s1484_s29  }
  0x19   : > { %s1485_s15 = smov [#allocation5]   ;;  %s1486_s26 = smov [#allocation11]  }
  0x1a   : > { %s283_s21 = sshll.u32 %s1485_s15, 4  ;;  %s308_s9 = sshll.u32 %s1486_s26, 4  ;;  %s284_s21 = int_to_ptr.vmem [resolvable:$true] %s283_s21  ;;  %s309_s9 = int_to_ptr.vmem [resolvable:$true] %s308_s9 }
  0x1b   : > { %1190 = dma.hbm_to_vmem [thread:$0]  (!%p1605_p10), %s282_s22, 128, %s284_s21, [#allocation6]  }
  0x1c   : > { %s329_s27 = sshll.u32 %s1794_s7, 4  ;;  %s1487_s16 = smov [#allocation12]   ;;  %s330_s27 = int_to_ptr.hbm [resolvable:$true] %s329_s27 }
  0x1d   : > { %1196 = dma.hbm_to_vmem [thread:$0]  (!%p1605_p10), %s307_s2, 512, %s309_s9, [#allocation10], %s1483_s28, %s1483_s28, %s1484_s29  }
  0x1e   : > { %s331_s14 = sshll.u32 %s1487_s16, 4  ;;  %p1134_p11 = scmp.ge.s32.totalorder %s1480_s13, 2  ;;  %s332_s14 = int_to_ptr.vmem [resolvable:$true] %s331_s14 }
  0x1f   : > { %1199 = dma.hbm_to_vmem [thread:$0]  (!%p1605_p10), %s330_s27, 512, %s332_s14, [#allocation13], %s1483_s28, %s1483_s28, %s1484_s29  }
  0x20   : > { %344 = sbr.rel (%p1134_p11) target bundleno = 49 (0x31), region = 48 }
  0x25   : > { %347 = sbr.rel (!%p1577_p3) target bundleno = 49 (0x31), region = 52  ;;  %s349_s15 = sand.u32 (%p1577_p3), 1, %s1468_s10  }
  0x26   : > { %s1136_s8 = sshll.u32 (%p1577_p3), %s1476_s12, 2  ;;  %s1135_s21 = sshll.u32 (%p1577_p3), %s349_s15, 5 }
  0x27   : > { %s356_s2 = scalar_lea.vmem (%p1577_p3), %s1788_s1, %s1136_s8  ;;  %s351_s9 = scalar_lea.vmem (%p1577_p3), [#allocation8], %s1135_s21 }
  0x28   : > { %v373_v0 = vld [vmem:[%s356_s2] sm:$0xf] (%p1577_p3)  ;;  %v375_v1 = vld [vmem:[%s356_s2 + $0x8] sm:$0xf] (%p1577_p3)  ;;  %v377_v2 = vld [vmem:[%s356_s2 + $0x10] sm:$0xf] (%p1577_p3) }
  0x29   : > { %374 = vst [vmem:[%s351_s9] sm:$0xf] (%p1577_p3), %v373_v0  ;;  %v379_v3 = vld [vmem:[%s356_s2 + $0x18] sm:$0xf] (%p1577_p3)  ;;  %v381_v4 = vld [vmem:[%s356_s2 + $0x20] sm:$0xf] (%p1577_p3) }
  0x2a   : > { %376 = vst [vmem:[%s351_s9 + $0x4] sm:$0xf] %v375_v1  ;;  %v383_v5 = vld [vmem:[%s356_s2 + $0x28] sm:$0xf]  ;;  %v385_v6 = vld [vmem:[%s356_s2 + $0x30] sm:$0xf] }
  0x2b   : > { %378 = vst [vmem:[%s351_s9 + $0x8] sm:$0xf] %v377_v2  ;;  %v387_v7 = vld [vmem:[%s356_s2 + $0x38] sm:$0xf] }
  0x2c   : > { %380 = vst [vmem:[%s351_s9 + $0xc] sm:$0xf] %v379_v3 }
  0x2d   : > { %382 = vst [vmem:[%s351_s9 + $0x10] sm:$0xf] %v381_v4 }
  0x2e   : > { %384 = vst [vmem:[%s351_s9 + $0x14] sm:$0xf] %v383_v5 }
  0x2f   : > { %386 = vst [vmem:[%s351_s9 + $0x18] sm:$0xf] %v385_v6 }
  0x30   : > { %388 = vst [vmem:[%s351_s9 + $0x1c] sm:$0xf] %v387_v7 }
  0x31 PF: > { %431 = sbr.rel (%p1585_p7) target bundleno = 1530 (0x5fa), region = 93 }
  0x36   : > { %1447 = dma.done.wait (%p1591_p8), [#allocation6], 128  }
  0x37   : > { %1449 = vsyncadd (%p1591_p8), [#allocation6], 4294967168  ;;  %s439_s17 = sand.u32 1, %s1464_s30  }
  0x38   : > { %s1139_s25 = sshll.u32 %s439_s17, 5 }
  0x39   : > { %s441_s28 = scalar_lea.vmem [#allocation8], %s1139_s25 }
  0x3a   : > { %1451 = dma.done.wait (%p1591_p8), [#allocation10], 1024  }
  0x3b   : > { %1453 = vsyncadd (%p1591_p8), [#allocation10], 4294966272 }
  0x3c   : > { %1455 = dma.done.wait (%p1591_p8), [#allocation13], 512  }
  0x3d   : > { %1457 = vsyncadd (%p1591_p8), [#allocation13], 4294966784  ;;  %v1649_v8 = vld [vmem:[%s441_s28] sm:$0xf]  ;;  %v1651_v9 = vld [vmem:[%s441_s28 + $0x4] sm:$0xf] }
  0x3e   : > { %v1653_v10 = vld [vmem:[%s441_s28 + $0x8] sm:$0xf]  ;;  %v1655_v11 = vld [vmem:[%s441_s28 + $0xc] sm:$0xf]  ;;  %v1657_v12 = vld [vmem:[%s441_s28 + $0x10] sm:$0xf] }
  0x3f   : > { %v1659_v13 = vld [vmem:[%s441_s28 + $0x14] sm:$0xf]  ;;  %v1661_v14 = vld [vmem:[%s441_s28 + $0x18] sm:$0xf]  ;;  %v1663_v15 = vld [vmem:[%s441_s28 + $0x1c] sm:$0xf] }
  0x40   : > { %p1143_p12 = scmp.ne.s32.totalorder %s1472_s11, 0 }
  0x42   : > { %497 = sbr.rel (%p1143_p12) target bundleno = 323 (0x143), region = 117 }
  0x47   : > { %v498_v16 = vld [vmem:[#allocation5] sm:$0xff]  ;;  %v499_v17 = vlaneseq  ;;  %vm503_vm1 = vcmask 130048   ;;  %v525_v27 = vunpack.c.l.bf16 %v1651_v9  ;;  %v526_v28 = vunpack.c.l.bf16 %v1653_v10 }
  0x48   : > { %vm501_vm0 = vcmp.eq.s32.totalorder %v498_v16, 7  ;;  %v524_v29 = vunpack.c.l.bf16 %v1649_v8  ;;  %v527_v30 = vunpack.c.l.bf16 %v1655_v11  ;;  %v528_v32 = vunpack.c.l.bf16 %v1657_v12 }
  0x49   : > { %v500_v18 = vand.u32 127, %v499_v17  ;;  %v540_v31 = vrot.slane %v525_v27, 7  ;;  %vm541_vm3 = vcmask 1041409   ;;  %v543_v33 = vrot.slane %v526_v28, 6 }
  0x4a   : > { %v529_v34 = vunpack.c.l.bf16 %v1659_v13  ;;  %vm544_vm4 = vcmask 1042434   ;;  %v546_v36 = vrot.slane %v527_v30, 5  ;;  %v530_v37 = vunpack.c.l.bf16 %v1661_v14 }
  0x4b   : > { %v502_v19 = vsel %vm501_vm0, %v500_v18, 16  ;;  %v542_v35 = vsel %vm541_vm3, %v540_v31, %v524_v29  ;;  %vm547_vm5 = vcmask 1043459   ;;  %v549_v39 = vrot.slane %v528_v32, 4 }
  0x4c   : > { %v504_v20 = vsel %vm503_vm1, %v502_v19, 2147483647  ;;  %v545_v38 = vsel %vm544_vm4, %v543_v33, %v542_v35  ;;  %v531_v40 = vunpack.c.l.bf16 %v1663_v15  ;;  %vm550_vm6 = vcmask 1044484  }
  0x4d   : > { %v506_v21 = vshra.s32 %v504_v20, 16  ;;  %v505_v23 = vand.u32 65535, %v504_v20  ;;  %v548_v41 = vsel %vm547_vm5, %v546_v36, %v545_v38  ;;  %v552_v42 = vrot.slane %v529_v34, 3 }
  0x4e   : > { %v551_v43 = vsel %vm550_vm6, %v549_v39, %v548_v41  ;;  %vm553_vm7 = vcmask 1045509   ;;  %v555_v44 = vrot.slane %v530_v37, 2  ;;  %vm556_vm8 = vcmask 1046534  }
  0x4f   : > { %v508_v22 = vcvt.s32.f32 %v506_v21  ;;  %v507_v24 = vcvt.s32.f32 %v505_v23  ;;  %v554_v45 = vsel %vm553_vm7, %v552_v42, %v551_v43  ;;  %v558_v46 = vrot.slane %v531_v40, 1 }
  0x50   : > { %v557_v47 = vsel %vm556_vm8, %v555_v44, %v554_v45  ;;  %vm559_vm9 = vcmask 1047559   ;;  %vm562_vm10 = vcmask 261120   ;;  %v1488_v49 = vmov 0.0  }
  0x51   : > { %509 = vmin.xlane.f32.xlu0 %v508_v22  ;;  %v560_v48 = vsel %vm559_vm9, %v558_v46, %v557_v47  ;;  %564 = vst.msk [vmem:[#allocation3] sm:$0xff] %vm562_vm10, %v1488_v49  ;;  %vm522_vm11 = vcmask 7168  }
  0x52   : > { %563 = vst.msk [vmem:[#allocation2] sm:$0xff] %vm562_vm10, %v560_v48 }
  0xc4   : > { %v510_v25 = vpop.xlane.xlu0 %509 }
  0xc5   : > { %vm511_vm2 = vcmp.eq.f32.partialorder %v508_v22, %v510_v25  ;;  %v516_v50 = vcvt.f32.s32 %v510_v25 }
  0xc6   : > { %v512_v26 = vsel %vm511_vm2, %v507_v24, inf }
  0xc7   : > { %513 = vmin.xlane.f32.xlu0 %v512_v26  ;;  %v517_v52 = vshll.u32 %v516_v50, 16 }
 0x13a   : > { %v514_v51 = vpop.xlane.xlu0 %513 }
 0x13b   : > { %v515_v53 = vcvt.f32.s32 %v514_v51 }
 0x13d   : > { %v518_v54 = vadd.s32 %v517_v52, %v515_v53 }
 0x13f   : > { %vm519_vm12 = vcmp.lt.s32.totalorder %v518_v54, 16  ;;  %v520_v55 = vadd.s32 1, %v518_v54 }
 0x141   : > { %v521_v56 = vsel %vm519_vm12, %v520_v55, 1 }
 0x142   : > { %523 = vst.msk [vmem:[#allocation4] sm:$0xff] %vm522_vm11, %v521_v56 }
 0x143 PF: > { %v1489_v58 = vmov 0   ;;  %vm611_vm13 = vcmask 1043456   ;;  %v566_v3 = vlaneseq  ;;  %s1144_s30 = sshll.u32 %s1472_s11, 3  ;;  %v1490_v16 = vmov 0.0   ;;  %p1158_p13 = scmp.ne.s32.totalorder %s1472_s11, 1 }
 0x144   : > { %1262 = vset.pattern.permute.xlu0 %v1489_v58  ;;  %v613_v59 = vsel %vm611_vm13, %v1649_v8, 0  ;;  %v634_v60 = vsel %vm611_vm13, %v1651_v9, 0  ;;  %v655_v61 = vsel %vm611_vm13, %v1653_v10, 0  ;;  %v676_v62 = vsel %vm611_vm13, %v1655_v11, 0  ;;  %s1809_s19 = sld [smem:[#allocation22_spill]] (!%p1158_p13) }
 0x145   : > { %622 = vmatpush.bf16.msra.mxu0 %v613_v59  ;;  %643 = vmatpush.bf16.msra.mxu1 %v634_v60  ;;  %v739_v63 = vsel %vm611_vm13, %v1661_v14, 0  ;;  %v760_v0 = vsel %vm611_vm13, %v1663_v15, 0  ;;  %v697_v1 = vsel %vm611_vm13, %v1657_v12, 0  ;;  %v718_v2 = vsel %vm611_vm13, %v1659_v13, 0 }
 0x146   : > { %664 = vmatpush.bf16.msra.mxu2 %v655_v61  ;;  %685 = vmatpush.bf16.msra.mxu3 %v676_v62  ;;  %v1686_v4 = vand.u32 127, %v566_v3  ;;  %v569_v5 = vstv %s1144_s30  ;;  %vm580_vm15 = vcmask 1040384   ;;  %vm585_vm0 = vcmask 1041409  }
 0x147   : > { %vm607_vm1 = vcmask 64512   ;;  %vm589_vm2 = vcmask 1042434   ;;  %vm593_vm3 = vcmask 1043459   ;;  %vm791_vm4 = vcmask 1044484  }
 0x148   : > { %v570_v6 = vadd.s32 %v569_v5, %v1686_v4  ;;  %vm794_vm5 = vcmask 1045509   ;;  %vm797_vm6 = vcmask 1046534   ;;  %vm800_vm7 = vcmask 1047559  }
 0x149   : > { %v1674_v57 = vld [vmem:[#allocation4] sm:$0xff]  ;;  %706 = vmatpush.bf16.msrb.mxu0 %v697_v1  ;;  %727 = vmatpush.bf16.msrb.mxu1 %v718_v2  ;;  %vm804_vm8 = vcmask 261120  }
 0x14a   : > { %572 = vperm.xlu0 %1262, %v1674_v57   ;;  %748 = vmatpush.bf16.msrb.mxu2 %v739_v63 }
 0x14b   : > { %769 = vmatpush.bf16.msrb.mxu3 %v760_v0 }
 0x1bc   : > { %v573_v7 = vpop.permute.xlu0 %572 }
 0x1bd   : > { %vm574_vm14 = vcmp.ge.s32.totalorder %v570_v6, %v573_v7 }
 0x1be   : > { %v1145_v17 = vsel %vm574_vm14, 1.0, %v1490_v16 }
 0x1bf   : > { %v577_v18 = vpack.c.bf16 %v1145_v17, %v1145_v17 }
 0x1c1   : > { %v579_v19 = vrot.slane %v577_v18, 3 }
 0x1c3   : > { %v583_v20 = vsel %vm580_vm15, %v577_v18, %v579_v19  ;;  %v586_v21 = vsel %vm585_vm0, %v577_v18, %v579_v19  ;;  %v590_v32 = vsel %vm589_vm2, %v577_v18, %v579_v19  ;;  %v594_v34 = vsel %vm593_vm3, %v577_v18, %v579_v19  ;;  %v775_v19 = vld [vmem:[#allocation3] sm:$0xff] }
 0x1c4   : > { %v1146_v22 = vpack.i.b16 %v583_v20, %v583_v20  ;;  %v598_v23 = vunpack.i.h.s16 %v583_v20  ;;  %v588_v24 = vrot.slane %v586_v21, 1  ;;  %v592_v35 = vrot.slane %v590_v32, 2 }
 0x1c5   : > { %v596_v36 = vrot.slane %v594_v34, 3 }
 0x1c6   : > { %v606_v25 = vperm.slane %v1146_v22, 0  ;;  %v628_v26 = vpack.i.b16 %v598_v23, %v598_v23  ;;  %v1149_v27 = vpack.i.b16 %v588_v24, %v588_v24  ;;  %v600_v28 = vunpack.i.h.s16 %v588_v24 }
 0x1c7   : > { %v602_v37 = vunpack.i.h.s16 %v592_v35  ;;  %v1152_v38 = vpack.i.b16 %v592_v35, %v592_v35  ;;  %v604_v39 = vunpack.i.h.s16 %v596_v36  ;;  %v1155_v41 = vpack.i.b16 %v596_v36, %v596_v36 }
 0x1c8   : > { %1147 = vmatmul.msk.bf16.vlgmr.msra.gmra.mxu0 %vm607_vm1, %v606_v25  ;;  %v629_v29 = vperm.slane %v628_v26, 0  ;;  %v650_v30 = vperm.slane %v1149_v27, 0  ;;  %v670_v31 = vpack.i.b16 %v600_v28, %v600_v28 }
 0x1c9   : > { %v712_v40 = vpack.i.b16 %v602_v37, %v602_v37  ;;  %v692_v42 = vperm.slane %v1152_v38, 0  ;;  %v754_v43 = vpack.i.b16 %v604_v39, %v604_v39  ;;  %v734_v45 = vperm.slane %v1155_v41, 0 }
 0x1ca   : > { %1148 = vmatmul.msk.bf16.vlgmr.msra.gmra.mxu1 %vm607_vm1, %v629_v29  ;;  %1150 = vmatmul.msk.bf16.vlgmr.msra.gmra.mxu2 %vm607_vm1, %v650_v30  ;;  %v671_v33 = vperm.slane %v670_v31, 0 }
 0x1cb   : > { %v713_v44 = vperm.slane %v712_v40, 0  ;;  %v755_v46 = vperm.slane %v754_v43, 0 }
 0x1cc   : > { %1151 = vmatmul.msk.bf16.vlgmr.msra.gmra.mxu3 %vm607_vm1, %v671_v33 }
 0x1d8   : > { %1153 = vmatmul.msk.bf16.vlgmr.msrb.gmra.mxu0 %vm607_vm1, %v692_v42 }
 0x1da   : > { %1154 = vmatmul.msk.bf16.vlgmr.msrb.gmra.mxu1 %vm607_vm1, %v713_v44  ;;  %1156 = vmatmul.msk.bf16.vlgmr.msrb.gmra.mxu2 %vm607_vm1, %v734_v45 }
 0x1dc   : > { %1157 = vmatmul.msk.bf16.vlgmr.msrb.gmra.mxu3 %vm607_vm1, %v755_v46 }
 0x245   : > { %v624_v47 = vpop.f32.mrf.mxu0 }
 0x247   : > { %v645_v48 = vpop.f32.mrf.mxu1 }
 0x248   : > { %v784_v53 = vrot.slane %v645_v48, 7 }
 0x24a   : > { %v785_v58 = vsel %vm585_vm0, %v784_v53, %v624_v47 }
 0x24d   : > { %v626_v49 = vpop.f32.mrf.mxu0  ;;  %v666_v50 = vpop.f32.mrf.mxu2 }
 0x24e   : > { %v786_v54 = vrot.slane %v666_v50, 6 }
 0x24f   : > { %v647_v51 = vpop.f32.mrf.mxu1  ;;  %v687_v52 = vpop.f32.mrf.mxu3 }
 0x250   : > { %v788_v59 = vrot.slane %v687_v52, 5  ;;  %v787_v62 = vsel %vm589_vm2, %v786_v54, %v785_v58 }
 0x252   : > { %v789_v0 = vsel %vm593_vm3, %v788_v59, %v787_v62 }
 0x255   : > { %v668_v55 = vpop.f32.mrf.mxu2  ;;  %v708_v56 = vpop.f32.mrf.mxu0 }
 0x256   : > { %v790_v63 = vrot.slane %v708_v56, 4 }
 0x257   : > { %v689_v60 = vpop.f32.mrf.mxu3  ;;  %v729_v61 = vpop.f32.mrf.mxu1 }
 0x258   : > { %v793_v1 = vrot.slane %v729_v61, 3  ;;  %v792_v2 = vsel %vm791_vm4, %v790_v63, %v789_v0 }
 0x25a   : > { %v795_v7 = vsel %vm794_vm5, %v793_v1, %v792_v2 }
 0x25d   : > { %v710_v3 = vpop.f32.mrf.mxu0  ;;  %v750_v5 = vpop.f32.mrf.mxu2 }
 0x25e   : > { %v796_v6 = vrot.slane %v750_v5, 2 }
 0x25f   : > { %v731_v16 = vpop.f32.mrf.mxu1  ;;  %v771_v17 = vpop.f32.mrf.mxu3 }
 0x260   : > { %v798_v18 = vsel %vm797_vm6, %v796_v6, %v795_v7  ;;  %v799_v20 = vrot.slane %v771_v17, 1 }
 0x262   : > { %v801_v21 = vsel %vm800_vm7, %v799_v20, %v798_v18 }
 0x263   : > { %v803_v22 = vadd.f32 %v801_v21, %v775_v19  ;;  %809 = sbr.rel (%p1158_p13) target bundleno = 1520 (0x5f0), region = 121 }
 0x265   : > { %805 = vst.msk [vmem:[#allocation3] sm:$0xff] %vm804_vm8, %v803_v22  ;;  %v752_v23 = vpop.f32.mrf.mxu2 }
 0x267   : > { %v773_v24 = vpop.f32.mrf.mxu3 }
 0x268   : > { %v811_v25 = vcvt.s32.f32 %v1674_v57  ;;  %v1491_v26 = vmov 0   ;;  %v867_v31 = vld [vmem:[#allocation11 + $0x18] sm:$0xff]  ;;  %v866_v33 = vld [vmem:[#allocation11 + $0x10] sm:$0xff]  ;;  %v865_v35 = vld [vmem:[#allocation11 + $0x8] sm:$0xff]  ;;  %v822_v41 = vunpack.c.l.bf16 %v1649_v8  ;;  %v823_v42 = vunpack.c.l.bf16 %v1651_v9 }
 0x269   : > { %1263 = vset.pattern.permute.xlu0 %v1491_v26  ;;  %1264 = vset.pattern.permute.xlu2 %v1491_v26  ;;  %v863_v32 = vld [vmem:[#allocation9 + $0x18] sm:$0xff]  ;;  %v862_v34 = vld [vmem:[#allocation9 + $0x10] sm:$0xff]  ;;  %v861_v36 = vld [vmem:[#allocation9 + $0x8] sm:$0xff]  ;;  %v824_v43 = vunpack.c.l.bf16 %v1653_v10  ;;  %v825_v46 = vunpack.c.l.bf16 %v1655_v11  ;;  %v826_v49 = vunpack.c.l.bf16 %v1657_v12  ;;  %v827_v52 = vunpack.c.l.bf16 %v1659_v13 }
 0x26a   : > { %v812_v27 = vsub.f32 16.0, %v811_v25  ;;  %883 = vmatpush.msra.mxu0 %v867_v31  ;;  %906 = vmatpush.msra.mxu1 %v863_v32  ;;  %v864_v57 = vld [vmem:[#allocation11] sm:$0xff]  ;;  %v927_v39 = vld [vmem:[%s1792_s5 + $0x38] sm:$0xff]  ;;  %v926_v40 = vld [vmem:[%s1792_s5 + $0x30] sm:$0xff]  ;;  %v844_v44 = vrot.slane %v822_v41, 7  ;;  %v845_v45 = vrot.slane %v823_v42, 6  ;;  %v828_v53 = vunpack.c.l.bf16 %v1661_v14 }
 0x26b   : > { %v860_v37 = vld [vmem:[#allocation9] sm:$0xff]  ;;  %944 = vmatpush.msra.mxu2 %v927_v39  ;;  %v847_v47 = vrot.slane %v824_v43, 5  ;;  %v849_v50 = vrot.slane %v825_v46, 4  ;;  %v851_v8 = vrot.slane %v826_v49, 3  ;;  %v853_v10 = vrot.slane %v827_v52, 2  ;;  %v925_v14 = vld [vmem:[%s1792_s5 + $0x28] sm:$0xff] }
 0x26c   : > { %v813_v28 = vmax.f32 %v812_v27, 1.0  ;;  %vm830_vm9 = vcmp.gt.f32.partialorder %v812_v27, 0.0  ;;  %884 = vmatpush.msra.mxu0 %v866_v33  ;;  %907 = vmatpush.msra.mxu1 %v862_v34  ;;  %v1710_v38 = vld [vmem:[#allocation2] sm:$0xff]  ;;  %v846_v48 = vsel %vm585_vm0, %v845_v45, %v844_v44  ;;  %v855_v11 = vrot.slane %v828_v53, 1  ;;  %v815_v59 = vld [vmem:[#allocation3] sm:$0xff]  ;;  %v923_v63 = vld [vmem:[%s1792_s5 + $0x18] sm:$0xff] }
 0x26d   : > { %v831_v30 = vsel %vm830_vm9, 1, %v1491_v26  ;;  %945 = vmatpush.msra.mxu2 %v926_v40  ;;  %v848_v51 = vsel %vm589_vm2, %v847_v47, %v846_v48  ;;  %v829_v58 = vunpack.c.l.bf16 %v1663_v15  ;;  %v924_v15 = vld [vmem:[%s1792_s5 + $0x20] sm:$0xff]  ;;  %v922_v0 = vld [vmem:[%s1792_s5 + $0x10] sm:$0xff]  ;;  %v921_v1 = vld [vmem:[%s1792_s5 + $0x8] sm:$0xff]  ;;  %vm932_vm11 = vcmask 523264  }
 0x26e   : > { %1270 = vrcp.f32 %v813_v28  ;;  %885 = vmatpush.msra.mxu0 %v865_v35  ;;  %908 = vmatpush.msra.mxu1 %v861_v36  ;;  %v850_v9 = vsel %vm593_vm3, %v849_v50, %v848_v51  ;;  %v920_v2 = vld [vmem:[%s1792_s5] sm:$0xff]  ;;  %vm956_vm12 = vcmask 15360   ;;  %v1492_v27 = vmov 1   ;;  %v983_v31 = vld [vmem:[#allocation12 + $0x18] sm:$0xff]  ;;  %v982_v32 = vld [vmem:[#allocation12 + $0x10] sm:$0xff] }
 0x26f   : > { %v852_v54 = vsel %vm791_vm4, %v851_v8, %v850_v9  ;;  %946 = vmatpush.msra.mxu2 %v925_v14  ;;  %v1267_v5 = vld [vmem:[%s1791_s4] ss:$0 sm:$0xff]  ;;  %1003 = vmatpush.msra.mxu3 %v983_v31  ;;  %v981_v33 = vld [vmem:[#allocation12 + $0x8] sm:$0xff]  ;;  %vm1011_vm13 = vcmp.eq.s32.totalorder %v1686_v4, 7  ;;  %vm1013_vm14 = vcmp.eq.s32.totalorder %v1686_v4, 8 }
 0x270   : > { %886 = vmatpush.msra.mxu0 %v864_v57  ;;  %909 = vmatpush.msra.mxu1 %v860_v37  ;;  %v854_v56 = vsel %vm794_vm5, %v853_v10, %v852_v54  ;;  %v1268_v18 = vld [vmem:[%s1793_s6] ss:$0 sm:$0xff] }
 0x271   : > { %1160 = vmatmul.msk.f32.vlgmr.msra.gmra.mxu1 %vm804_vm8, %v1710_v38  ;;  %v856_v12 = vsel %vm797_vm6, %v855_v11, %v854_v56  ;;  %947 = vmatpush.msra.mxu2 %v924_v15  ;;  %v980_v34 = vld [vmem:[#allocation12] sm:$0xff] }
 0x272   : > { %v857_v60 = vsel %vm800_vm7, %v829_v58, %v856_v12  ;;  %1004 = vmatpush.msra.mxu3 %v982_v32  ;;  %v1269_v40 = vld [vmem:[%s1809_s19] ss:$0 sm:$0xff] }
 0x273   : > { %948 = vmatpush.msra.mxu2 %v923_v63 }
 0x274   : > { %v1271_v29 = vpop.eup %1270  ;;  %1005 = vmatpush.msra.mxu3 %v981_v33 }
 0x275   : > { %818 = vperm.xlu0 %1263, %v1271_v29   ;;  %949 = vmatpush.msra.mxu2 %v922_v0 }
 0x276   : > { %1006 = vmatpush.msra.mxu3 %v980_v34 }
 0x277   : > { %950 = vmatpush.msra.mxu2 %v921_v1 }
 0x279   : > { %951 = vmatpush.msra.mxu2 %v920_v2 }
 0x27d   : > { %833 = vperm.xlu0 %1263, %v831_v30  }
 0x285   : > { %1266 = vset.pattern.permute.xlu0 %v1492_v27 }
 0x2e7   : > { %v819_v55 = vpop.permute.xlu0 %818 }
 0x2e8   : > { %v821_v13 = vmul.f32 %v819_v55, %v815_v59 }
 0x2ee   : > { %v911_v3 = vpop.f32.mrf.mxu1 }
 0x2ef   : > { %v834_v61 = vpop.permute.xlu0 %833 }
 0x2f0   : > { %vm835_vm10 = vcmp.eq.s32.totalorder %v834_v61, 1 }
 0x2f1   : > { %v859_v62 = vsel %vm835_vm10, %v821_v13, %v857_v60 }
 0x2f2   : > { %1159 = vmatmul.msk.f32.vlgmr.msra.gmra.mxu0 %vm804_vm8, %v859_v62 }
 0x36f   : > { %v888_v6 = vpop.f32.mrf.mxu0 }
 0x370   : > { %v912_v7 = vadd.f32 %v911_v3, %v888_v6 }
 0x372   : > { %v918_v16 = vadd.f32 %v1267_v5, %v912_v7 }
 0x374   : > { %1272 = vtanh.f32 %v918_v16 }
 0x37a   : > { %v1273_v17 = vpop.eup %1272 }
 0x37b   : > { %1161 = vmatmul.msk.f32.vlgmr.msra.gmra.mxu2 %vm932_vm11, %v1273_v17 }
 0x3fe   : > { %v953_v19 = vpop.f32.mrf.mxu2 }
 0x3ff   : > { %v954_v20 = vadd.f32 %v1268_v18, %v953_v19 }
 0x401   : > { %v957_v21 = vsel %vm956_vm12, %v954_v20, -inf }
 0x402   : > { %958 = vmax.xlane.f32.xlu1 %v957_v21 }
 0x475   : > { %v959_v22 = vpop.xlane.xlu1 %958 }
 0x476   : > { %v960_v23 = vsub.f32 %v954_v20, %v959_v22 }
 0x478   : > { %v961_v24 = vmul.f32 1.442695, %v960_v23 }
 0x47a   : > { %1274 = vpow2.f32 %v961_v24 }
 0x480   : > { %v1275_v25 = vpop.eup %1274 }
 0x481   : > { %v963_v26 = vsel %vm956_vm12, %v1275_v25, 0.0 }
 0x482   : > { %964 = vadd.xlane.f32.xlu1 %v963_v26 }
 0x4f5   : > { %v965_v28 = vpop.xlane.xlu1 %964 }
 0x4f6   : > { %1276 = vrcp.f32 %v965_v28 }
 0x4fc   : > { %v1277_v29 = vpop.eup %1276 }
 0x4fd   : > { %v967_v30 = vmul.f32 %v1277_v29, %v1275_v25 }
 0x4ff   : > { %970 = vperm.xlu2 %1264, %v967_v30  }
 0x507   : > { %1265 = vset.pattern.permute.xlu2 %v1492_v27 }
 0x508   : > { %975 = vperm.xlu2 %1265, %v967_v30  }
 0x559   : > { %v971_v35 = vpop.permute.xlu2 %970 }
 0x55a   : > { %v973_v57 = vmul.f32 %v971_v35, %v1710_v38 }
 0x562   : > { %v976_v36 = vpop.permute.xlu2 %975 }
 0x563   : > { %v978_v37 = vmul.f32 %v976_v36, %v859_v62 }
 0x565   : > { %v979_v39 = vadd.f32 %v978_v37, %v973_v57 }
 0x567   : > { %1162 = vmatmul.msk.f32.vlgmr.msra.gmra.mxu3 %vm804_vm8, %v979_v39 }
 0x5ea   : > { %v1008_v41 = vpop.f32.mrf.mxu3 }
 0x5eb   : > { %v1009_v42 = vadd.f32 %v1269_v40, %v1008_v41 }
 0x5ed   : > { %v1012_v43 = vsel %vm1011_vm13, %v971_v35, %v1009_v42 }
 0x5ee   : > { %v1014_v44 = vsel %vm1013_vm14, %v976_v36, %v1012_v43 }
 0x5ef   : > { %1015 = vst [vmem:[#allocation14] sm:$0xff] %v1014_v44 }
 0x5f0 PF: > { %s1810_s20 = sadd.s32 4294967295, %s1480_s13   ;;  %s1811_s26 = sld [smem:[#allocation23_spill]] }
 0x5f1   : > { %p1208_p0 = scmp.eq.s32.totalorder %s1810_s20, 1  ;;  %s1493_s27 = smov [#allocation14]  }
 0x5f2   : > { %s1024_s16 = sshll.u32 %s1493_s27, 4  ;;  %s1025_s16 = int_to_ptr.vmem [resolvable:$true] %s1024_s16 }
 0x5f6   : > { %s1026_s24 = sshll.u32 %s1811_s26, 4  ;;  %s1027_s24 = int_to_ptr.hbm [resolvable:$true] %s1026_s24 }
 0x5f7   : > { %1184 = dma.vmem_to_hbm [thread:$0]  (%p1208_p0), %s1025_s16, 128, %s1027_s24, [#allocation7]  }
 0x5f8   : > { %1459 = dma.done.wait (%p1208_p0), [#allocation7], 128  }
 0x5f9   : > { %1461 = vsyncadd (%p1208_p0), [#allocation7], 4294967168 }
 0x5fa PF: > { %s23_s13 = sadd.s32 1, %s1480_s13   ;;  %s1812_s14 = sld [smem:[#allocation20_spill]] }
 0x5fb   : > { %p20_p1 = scmp.ge.s32.totalorder %s23_s13, 4   ;;  %s1813_s15 = sld [smem:[#allocation19_spill]] }
 0x5fc   : > { %s1814_s30 = smov %s1468_s10  ;;  %s1816_s11 = smov %s1476_s12 }
 0x5fd   :  { %22 = sbr.rel (!%p20_p1) target bundleno = 10 (0xa), region = 156 }
 0x600   : > { %s1815_s10 = smov %s1812_s14 }
 0x601   : > { %s1817_s12 = smov %s1813_s15 }
 0x602   :  { %1040 = vsyncpa [#allocation6], 1 }
 0x603   :  { %1042 = vsyncpa [#allocation6 + $0x1], 1 }
 0x604   :  { %1043 = vsyncpa [#allocation10], 1 }
 0x605   :  { %1044 = vsyncpa [#allocation13], 1 }
 0x606   :  { %1045 = vsyncpa [#allocation7], 1 }
 0x607   :  { %1047 = vsyncpa [#allocation7 + $0x1], 1 }

</bundles_post_ra>
